<compile_context>
chip_gen: v7x
topology: tpu7x:2x2x1
jax: 0.10.0
libtpu: 0.0.40
codegen_flags: <defaults>
</compile_context>

<pallas_src>
import functools
import math

import jax
import jax.numpy as jnp
from jax.experimental import pallas as pl
from jax.experimental.pallas import tpu as pltpu


def _round_up(x, m):
    return ((x + m - 1) // m) * m


def _pad_rows(x, rows):
    if x.shape[0] == rows:
        return x
    return jnp.pad(x, ((0, rows - x.shape[0]), (0, 0)))


# ----------------------- K/V projection pass (runs once) -----------------------

def _kv_proj_kernel(ft_ref, wkv_ref, kv_ref):
    kv_ref[...] = jnp.dot(
        ft_ref[...], wkv_ref[...],
        preferred_element_type=jnp.float32).astype(kv_ref.dtype)


def _project_kv(ft_p, wkv_p, tile):
    ct1p, d = ft_p.shape
    n_out = wkv_p.shape[1]
    return pl.pallas_call(
        _kv_proj_kernel,
        out_shape=jax.ShapeDtypeStruct((ct1p, n_out), jnp.bfloat16),
        grid_spec=pltpu.PrefetchScalarGridSpec(
            num_scalar_prefetch=0,
            grid=(ct1p // tile,),
            in_specs=[
                pl.BlockSpec((tile, d), lambda i: (i, 0)),     # Ft_1 row tile
                pl.BlockSpec((d, n_out), lambda i: (0, 0)),    # [W_k | W_v] resident
            ],
            out_specs=pl.BlockSpec((tile, n_out), lambda i: (i, 0)),
        ),
        compiler_params=pltpu.CompilerParams(
            dimension_semantics=("parallel",),
            vmem_limit_bytes=48 * 1024 * 1024),
    )(ft_p, wkv_p)


# ----------------------- flash-style attention pass -----------------------

def _attention_head_kernel(ht_ref, wq_ref, kv_ref, o_ref,
                           q_sc, m_sc, l_sc, *, kvp, kv_len, tkv, mask_kv):
    ki = pl.program_id(1)
    last = pl.num_programs(1) - 1

    @pl.when(ki == 0)
    def _():
        # Q projection hoisted out of the kv loop (depends only on the q tile).
        # The 1/sqrt(kvdim) scale is already folded into W_q by the wrapper.
        q_sc[...] = jnp.dot(
            ht_ref[...], wq_ref[...],
            preferred_element_type=jnp.float32).astype(q_sc.dtype)
        m_sc[...] = jnp.full_like(m_sc, -jnp.inf)
        l_sc[...] = jnp.zeros_like(l_sc)
        o_ref[...] = jnp.zeros_like(o_ref)   # o_ref doubles as the flash accumulator

    # Lane-aligned (multiple-of-128) slices of the fused K|V tile -> no re-layout.
    k = kv_ref[:, :kvp]
    v = kv_ref[:, kvp:]

    # Scores: contract the feature axis directly (no explicit k.T transpose).
    s = jax.lax.dot_general(
        q_sc[...], k,
        dimension_numbers=(((1,), (1,)), ((), ())),
        preferred_element_type=jnp.float32)

    def accumulate(scores):
        m_prev = m_sc[...]
        m_new = jnp.maximum(m_prev, jnp.max(scores, axis=-1, keepdims=True))
        alpha = jnp.exp(m_prev - m_new)
        p = jnp.exp(scores - m_new)
        l_sc[...] = alpha * l_sc[...] + jnp.sum(p, axis=-1, keepdims=True)
        o_ref[...] = alpha * o_ref[...] + jnp.dot(
            p.astype(jnp.bfloat16), v, preferred_element_type=jnp.float32)
        m_sc[...] = m_new

    if mask_kv:
        # Only the final kv tile can contain padded rows; gate the mask work on it.
        # The wrapper's padding guarantees the last tile has >=1 real row, so m_new
        # stays finite (no fully-masked-tile NaN).
        @pl.when(ki == last)
        def _():
            col = ki * tkv + jax.lax.broadcasted_iota(jnp.int32, s.shape, 1)
            accumulate(jnp.where(col < kv_len, s, -jnp.inf))

        @pl.when(ki != last)
        def _():
            accumulate(s)
    else:
        accumulate(s)

    @pl.when(ki == last)
    def _():
        o_ref[...] = o_ref[...] * pl.reciprocal(l_sc[...], approx=True)


# ----------------------- wrappers -----------------------

def prepare_weights(w_q, w_k, w_v):
    """One-time weight prep: pad kvdim to a lane-dense multiple of 128, fold the
    1/sqrt(kvdim) softmax scale into W_q (in f32, before the bf16 cast), and fuse
    W_k/W_v into one wide matrix. Reuse the result across forward calls."""
    d, kvdim = w_q.shape
    kvp = _round_up(kvdim, 128)
    scale = 1.0 / math.sqrt(float(kvdim))
    f32 = jnp.float32
    wq_p = jnp.zeros((d, kvp), f32).at[:, :kvdim].set(w_q.astype(f32) * scale)
    wk_p = jnp.zeros((d, kvp), f32).at[:, :kvdim].set(w_k.astype(f32))
    wv_p = jnp.zeros((d, kvp), f32).at[:, :kvdim].set(w_v.astype(f32))
    wkv_p = jnp.concatenate([wk_p, wv_p], axis=1)
    return wq_p.astype(jnp.bfloat16), wkv_p.astype(jnp.bfloat16), kvdim


def attention_head_apply(ht, ft_1, wq_p, wkv_p, kvdim, *, q_tile=256, kv_tile=512):
    ct, d = ht.shape
    ct_1 = ft_1.shape[0]
    kvp = wq_p.shape[1]

    # Sublane-aligned sequence padding + tile selection.
    ctp = _round_up(ct, 8)
    ct1p = _round_up(ct_1, 8)

    tq = min(q_tile, ctp)
    if ctp <= q_tile and ctp >= 16:
        # Guarantee >=2 q tiles so the "parallel" grid axis can shard across both
        # v7x TensorCores (harmless on single-TC v5e/v6e).
        tq = _round_up(ctp // 2, 8)
    tkv = min(kv_tile, ct1p)
    ctp = _round_up(ctp, tq)
    ct1p = _round_up(ct1p, tkv)

    bf16 = jnp.bfloat16
    ht_p = _pad_rows(ht, ctp).astype(bf16)
    ft_p = _pad_rows(ft_1, ct1p).astype(bf16)

    mask_kv = ct1p != ct_1  # only mask when real padding rows were added to Ft_1

    # K/V projection computed once (not once per q tile), already in bf16.
    kv_p = _project_kv(ft_p, wkv_p, tkv)

    kernel = functools.partial(
        _attention_head_kernel,
        kvp=kvp, kv_len=ct_1, tkv=tkv, mask_kv=mask_kv)

    out_p = pl.pallas_call(
        kernel,
        out_shape=jax.ShapeDtypeStruct((ctp, kvp), jnp.float32),
        grid_spec=pltpu.PrefetchScalarGridSpec(
            num_scalar_prefetch=0,
            grid=(ctp // tq, ct1p // tkv),
            in_specs=[
                pl.BlockSpec((tq, d), lambda qi, ki: (qi, 0)),        # Ht tile
                pl.BlockSpec((d, kvp), lambda qi, ki: (0, 0)),        # W_q (pre-scaled, resident)
                pl.BlockSpec((tkv, 2 * kvp), lambda qi, ki: (ki, 0)), # fused K|V tile (streams)
            ],
            out_specs=pl.BlockSpec((tq, kvp), lambda qi, ki: (qi, 0)),
            scratch_shapes=[
                pltpu.VMEM((tq, kvp), jnp.bfloat16),   # hoisted Q tile
                pltpu.VMEM((tq, 1), jnp.float32),      # running row max
                pltpu.VMEM((tq, 1), jnp.float32),      # running softmax denom
            ],
        ),
        compiler_params=pltpu.CompilerParams(
            dimension_semantics=("parallel", "arbitrary"),
            vmem_limit_bytes=48 * 1024 * 1024),
    )(ht_p, wq_p, kv_p)

    # TODO(synk): ret_attn=True (returning the full softmax matrix) is not
    # representable with flash-style accumulation; only the weighted output is produced.
    return out_p[:ct, :kvdim]


def attention_head(ht, ft_1, w_q, w_k, w_v, *, q_tile=256, kv_tile=512):
    """Convenience wrapper matching AttentionHead.forward(Ht, Ft_1)."""
    wq_p, wkv_p, kvdim = prepare_weights(w_q, w_k, w_v)
    return attention_head_apply(ht, ft_1, wq_p, wkv_p, kvdim,
                                q_tile=q_tile, kv_tile=kv_tile)


# ----------------------- reference & test -----------------------

def xavier_uniform(key, shape, dtype=jnp.float32):
    # Matches torch.nn.init.xavier_uniform_ with gain=1 for a 2-D tensor.
    fan_in, fan_out = shape[0], shape[1]
    limit = math.sqrt(6.0 / (fan_in + fan_out))
    return jax.random.uniform(key, shape, dtype=dtype, minval=-limit, maxval=limit)


def reference_attention_head(ht, ft_1, w_q, w_k, w_v):
    q = ht @ w_q
    k = ft_1 @ w_k
    v = ft_1 @ w_v
    scores = q @ k.T / jnp.sqrt(jnp.float32(w_q.shape[1]))
    attn = jax.nn.softmax(scores, axis=-1)
    return attn @ v


if __name__ == "__main__":
    num_features = 32   # d
    kvdim = 16
    ct = 8              # |ct|   (query rows)
    ct_1 = 8            # |ct_1| (key/value rows)

    key = jax.random.PRNGKey(0)
    k_ht, k_ft, k_q, k_k, k_v = jax.random.split(key, 5)

    Ht = jax.random.normal(k_ht, (ct, num_features), dtype=jnp.float32)
    Ft_1 = jax.random.normal(k_ft, (ct_1, num_features), dtype=jnp.float32)

    W_q = xavier_uniform(k_q, (num_features, kvdim))
    W_k = xavier_uniform(k_k, (num_features, kvdim))
    W_v = xavier_uniform(k_v, (num_features, kvdim))

    out = attention_head(Ht, Ft_1, W_q, W_k, W_v)
    out = jax.block_until_ready(out)

    ref = reference_attention_head(Ht, Ft_1, W_q, W_k, W_v)
    assert out.shape == (ct, kvdim)
    max_err = float(jnp.max(jnp.abs(out - ref)))
    # bf16 operands with f32 accumulation -> relaxed tolerance vs. the f32 reference.
    assert jnp.allclose(out, ref, atol=5e-2, rtol=5e-2), f"mismatch vs reference, max_err={max_err}"

    print("KERNEL_OK")
</pallas_src>

<mosaic_0001>
module attributes {stable_mosaic.version = 11 : i64} {
  func.func @_kv_proj_kernel(%arg0: i32, %arg1: memref<8x32xbf16, #tpu.memory_space<vmem>>, %arg2: memref<32x256xbf16, #tpu.memory_space<vmem>>, %arg3: memref<8x256xbf16, #tpu.memory_space<vmem>>) attributes {dimension_semantics = [#tpu.dimension_semantics<parallel>], iteration_bounds = array<i64: 1>, scalar_prefetch = 0 : i64, scratch_operands = 0 : i64, tpu.core_type = #tpu.core_type<tc>, window_params = [{transform_indices = @transform_0, window_bounds = array<i64: 8, 32>}, {pipeline_mode = #tpu.pipeline_mode<synchronous>, transform_indices = @transform_1, window_bounds = array<i64: 32, 256>}, {transform_indices = @transform_2, window_bounds = array<i64: 8, 256>}]} {
    %c0 = arith.constant 0 : index
    %c0_0 = arith.constant 0 : index
    %0 = vector.load %arg1[%c0, %c0_0] : memref<8x32xbf16, #tpu.memory_space<vmem>>, vector<8x32xbf16>
    %c0_1 = arith.constant 0 : index
    %c0_2 = arith.constant 0 : index
    %1 = vector.load %arg2[%c0_1, %c0_2] : memref<32x256xbf16, #tpu.memory_space<vmem>>, vector<32x256xbf16>
    %cst = arith.constant dense<0.000000e+00> : vector<8x256xf32>
    %2 = tpu.matmul %0, %1, %cst {dimension_numbers = #tpu.dot_dimension_numbers<[1], [0], [0], [1], [0, 0, 1, 1], [], []>} : vector<8x32xbf16>, vector<32x256xbf16>, vector<8x256xf32> -> vector<8x256xf32>
    %3 = arith.truncf %2 : vector<8x256xf32> to vector<8x256xbf16>
    %c0_3 = arith.constant 0 : index
    %c0_4 = arith.constant 0 : index
    %4 = vector.load %arg3[%c0_3, %c0_4] : memref<8x256xbf16, #tpu.memory_space<vmem>>, vector<8x256xbf16>
    tpu.vector_store %arg3[%c0_3, %c0_4], %3 {strides = array<i32>} : memref<8x256xbf16, #tpu.memory_space<vmem>>, vector<8x256xbf16>,
    return
  }
  func.func @transform_0(%arg0: i32) -> (i32, i32) {
    %c0_i32 = arith.constant 0 : i32
    %c0_i32_0 = arith.constant 0 : i32
    return %arg0, %c0_i32 : i32, i32
  }
  func.func @transform_1(%arg0: i32) -> (i32, i32) {
    %c0_i32 = arith.constant 0 : i32
    %c0_i32_0 = arith.constant 0 : i32
    %c0_i32_1 = arith.constant 0 : i32
    return %c0_i32, %c0_i32_0 : i32, i32
  }
  func.func @transform_2(%arg0: i32) -> (i32, i32) {
    %c0_i32 = arith.constant 0 : i32
    %c0_i32_0 = arith.constant 0 : i32
    return %arg0, %c0_i32 : i32, i32
  }
}

</mosaic_0001>

<bundles_post_ra>
// kernel: tpu_custom_call.1
= control target key start
LH: loop header
LB: loop body
LE: loop exit
PB: predicated region body
PF: predicated region fallthrough
CT: control target
= control target key end

     0   :  { %7 = vsyncpa [#allocation3], 0  ;;  %s289_s0 = inlined_call_operand.hbm [shape: bf16[8,32], index: 0, kind: input, shape index: {}]   ;;  %s290_s1 = inlined_call_operand.hbm [shape: bf16[32,256], index: 1, kind: input, shape index: {}]   ;;  %s291_s2 = inlined_call_operand.hbm [shape: bf16[8,256], index: 2, kind: output, shape index: {}]  }
   0x1   :  { %8 = vsyncpa [#allocation6], 0 }
   0x2   :  { %9 = vsyncpa [#allocation4], 0  ;;  %s225_s9 = smov [#allocation2]   ;;  %s226_s11 = smov [#allocation5]  }
   0x3   :  { %s16_s10 = sshll.u32 %s225_s9, 4  ;;  %s25_s12 = sshll.u32 %s226_s11, 4  ;;  %s17_s10 = int_to_ptr.vmem [resolvable:$true] %s16_s10  ;;  %s246_s12 = int_to_ptr.vmem [resolvable:$true] %s25_s12 }
   0x4   :  { %s153_s15 = scalar_lea.hbm %s289_s0, 64 }
   0x5   :  { %p154_p0 = scmp.ne.s32.totalorder %s289_s0, %s153_s15  ;;  %p157_p1 = scmp.lt.u32.totalorder %s153_s15, %s289_s0 }
   0x7   :  { %p159_p2 = pnand %p157_p1, %p154_p0 }
   0x9   :  { %162 = shalt.err (!%p159_p2)
}
   0xa   :  { %s163_s20 = scalar_lea.vmem %s17_s10, 64  ;;  %p168_p4 = scmp.lt.s32.totalorder %s17_s10, %s17_s10 }
   0xb   :  { %p164_p3 = scmp.ne.s32.totalorder %s17_s10, %s163_s20  ;;  %p169_p5 = scmp.lt.s32.totalorder %s163_s20, %s163_s20 }
   0xd   :  { %p170_p6 = por %p169_p5, %p168_p4 }
   0xf   :  { %p171_p7 = pnand %p170_p6, %p164_p3 }
  0x11   :  { %174 = shalt.err (!%p171_p7)
}
  0x12   :  { %19 = dma.hbm_to_vmem [thread:$0]  %s289_s0, 64, %s17_s10, [#allocation3]  }
  0x13   :  { %s175_s25 = scalar_lea.hbm %s290_s1, 512 }
  0x14   :  { %p176_p8 = scmp.ne.s32.totalorder %s290_s1, %s175_s25  ;;  %p179_p9 = scmp.lt.u32.totalorder %s175_s25, %s290_s1 }
  0x16   :  { %p181_p10 = pnand %p179_p9, %p176_p8 }
  0x18   :  { %184 = shalt.err (!%p181_p10)
}
  0x19   :  { %s185_s30 = scalar_lea.vmem %s246_s12, 512  ;;  %p190_p12 = scmp.lt.s32.totalorder %s246_s12, %s246_s12 }
  0x1a   :  { %p186_p11 = scmp.ne.s32.totalorder %s246_s12, %s185_s30  ;;  %p191_p13 = scmp.lt.s32.totalorder %s185_s30, %s185_s30 }
  0x1c   :  { %p192_p0 = por %p191_p13, %p190_p12 }
  0x1e   :  { %p193_p1 = pnand %p192_p0, %p186_p11 }
  0x20   :  { %196 = shalt.err (!%p193_p1)
}
  0x21   :  { %s227_s0 = smov 128   ;;  %s228_s3 = smov 8  }
  0x22   :  { %31 = dma.hbm_to_vmem [thread:$0]  %s290_s1, 512, %s246_s12, [#allocation6], %s227_s0, %s227_s0, %s228_s3  }
  0x23   :  { %219 = dma.done.wait [#allocation3], 64  }
  0x24   :  { %220 = vsyncadd [#allocation3], 4294967232 }
  0x25   :  { %221 = dma.done.wait [#allocation6], 512  }
  0x26   :  { %222 = vsyncadd [#allocation6], 4294966784  ;;  %v229_v0 = vmov 0   ;;  %v147_v1 = vld [vmem:[#allocation5 + $0x4] ss:$8 sps:$4 sm:$0xff]   ;;  %vm64_vm0 = vcmask 261120  }
  0x27   :  { %100 = vmatprep.mubr.bf16.mxu0 %v229_v0  ;;  %v149_v2 = vld [vmem:[#allocation5] ss:$8 sps:$4 sm:$0xff]   ;;  %68 = vmatprep.subr.bf16.mxu0 %v147_v1  ;;  %v150_v3 = vld [vmem:[#allocation5 + $0x14] ss:$8 sps:$4 sm:$0xff]   ;;  %v152_v4 = vld [vmem:[#allocation5 + $0x10] ss:$8 sps:$4 sm:$0xff]  }
  0x28   :  { %69 = vmatpush1.bf16.msra.mxu0 %v149_v2  ;;  %v39_v5 = vld [vmem:[#allocation2] sm:$0xf]  ;;  %s230_s6 = smov [#allocation7]  }
  0x29   :  { %70 = vmatprep.subr.bf16.mxu0 %v150_v3  ;;  %s124_s7 = sshll.u32 %s230_s6, 4  ;;  %s125_s7 = int_to_ptr.vmem [resolvable:$true] %s124_s7 }
  0x2a   :  { %s197_s1 = scalar_lea.vmem %s125_s7, 128  ;;  %p202_p3 = scmp.lt.s32.totalorder %s125_s7, %s125_s7 }
  0x2b   :  { %p198_p2 = scmp.ne.s32.totalorder %s125_s7, %s197_s1  ;;  %p203_p4 = scmp.lt.s32.totalorder %s197_s1, %s197_s1 }
  0x2c   :  { %71 = vmatpush1.bf16.msra.mxu0 %v152_v4 }
  0x2d   :  { %p204_p5 = por %p203_p4, %p202_p3 }
  0x2f   :  { %138 = vmatmul.mubr.msk.bf16.vlgmr.msra.gmra.mrb[0].mxu0 %vm64_vm0, %v39_v5  ;;  %p205_p6 = pnand %p204_p5, %p198_p2 }
 0x102   :  { %v102_v6 = vpop.f32.mrb[0].mxu0 }
 0x103   :  { %v104_v7 = vpop.f32.mrb[1].mxu0 }
 0x104   :  { %v140_v8 = vpack.c.bf16 %v104_v7, %v102_v6  ;;  %v106_v9 = vpop.f32.mrb[2].mxu0 }
 0x105   :  { %v107_v10 = vpop.f32.mrb[3].mxu0 }
 0x106   :  { %117 = vst [vmem:[#allocation7] sm:$0xff] %v140_v8 }
 0x107   :  { %208 = shalt.err (!%p205_p6)
}
 0x108   :  { %s209_s10 = scalar_lea.hbm %s291_s2, 128 }
 0x109   :  { %p210_p7 = scmp.ne.s32.totalorder %s291_s2, %s209_s10  ;;  %p213_p8 = scmp.lt.u32.totalorder %s209_s10, %s291_s2 }
 0x10b   :  { %p215_p9 = pnand %p213_p8, %p210_p7 }
 0x10d   :  { %218 = shalt.err (!%p215_p9)
}
 0x10e   :  { %127 = dma.vmem_to_hbm [thread:$0]  %s125_s7, 128, %s291_s2, [#allocation4]  }
 0x10f   :  { %223 = dma.done.wait [#allocation4], 128  }
 0x110   :  { %224 = vsyncadd [#allocation4], 4294967168 }
 0x111   :  { %131 = vsyncpa [#allocation3], 1 }
 0x112   :  { %132 = vsyncpa [#allocation6], 1 }
 0x113   :  { %133 = vsyncpa [#allocation4], 1 }

</bundles_post_ra>
